<compile_context>
chip_gen: v5e
topology: v5e:2x2
jax: 0.10.0
libtpu: 0.0.40
codegen_flags: <defaults>
</compile_context>

<pallas_src>
import jax
import jax.numpy as jnp
from jax.experimental import pallas as pl
from jax.experimental.pallas import tpu as pltpu


def _round_up(x, m):
    return ((x + m - 1) // m) * m


def _sublane(dtype):
    it = jnp.dtype(dtype).itemsize
    return 8 if it >= 4 else (16 if it == 2 else 32)


def _vmem_capacity_bytes():
    """Per-TensorCore VMEM capacity; conservative 64 MiB if unknown (v7x)."""
    cap = None
    try:
        cap = int(pltpu.get_tpu_info().vmem_capacity_bytes)
    except Exception:
        cap = None
    if cap is None or cap <= 0:
        try:
            kind = jax.devices()[0].device_kind.lower()
        except Exception:
            kind = ""
        cap = (128 << 20) if any(t in kind for t in ("v4", "v5", "v6")) else (64 << 20)
    return max(cap, 64 << 20)


# ----------------------------------------------------------------------------
# Kernels
# ----------------------------------------------------------------------------
def _fcl_kernel_resident(x_ref, w1_ref, b1_ref, w2_ref, b2_ref, o_ref):
    # x_ref: (tm, Dp)  w*_ref: (Dp, Dp) compute dtype  b*_ref: (1, Dp) f32
    x = x_ref[...].astype(w1_ref.dtype)
    h = jnp.dot(x, w1_ref[...], preferred_element_type=jnp.float32)
    h = jnp.maximum(h + b1_ref[...], 0.0)
    y = jnp.dot(h.astype(w2_ref.dtype), w2_ref[...],
                preferred_element_type=jnp.float32)
    o_ref[...] = jnp.maximum(y + b2_ref[...], 0.0).astype(o_ref.dtype)


def _fcl_kernel_coltiled(x_ref, w1_ref, b1_ref, w2_ref, b2_ref, o_ref, h_ref):
    # Grid: (row tiles, W2 output-column tiles). W1 is resident; W2 is streamed
    # one (Dp, tn) slab at a time. h = relu(x@W1+b1) is computed once per row
    # tile (at j==0) into VMEM scratch and reused for every column slab.
    @pl.when(pl.program_id(1) == 0)
    def _():
        x = x_ref[...].astype(w1_ref.dtype)
        h = jnp.dot(x, w1_ref[...], preferred_element_type=jnp.float32)
        h_ref[...] = jnp.maximum(h + b1_ref[...], 0.0)

    h = h_ref[...].astype(w2_ref.dtype)
    y = jnp.dot(h, w2_ref[...], preferred_element_type=jnp.float32)
    o_ref[...] = jnp.maximum(y + b2_ref[...], 0.0).astype(o_ref.dtype)


# ----------------------------------------------------------------------------
# Parameter packing (do this once; hoisted out of the per-call path)
# ----------------------------------------------------------------------------
def pack_fcl_params(w1, b1, w2, b2, *, compute_dtype=jnp.bfloat16):
    """Transpose to (in, out), zero-pad the feature dim to a multiple of 128,
    and cast weights to the MXU compute dtype. Biases stay f32."""
    w1 = jnp.asarray(w1)
    w2 = jnp.asarray(w2)
    D = w1.shape[1]
    D_pad = max(_round_up(D, 128), 128)
    cdt = jnp.dtype(compute_dtype)
    w1_t = jnp.zeros((D_pad, D_pad), cdt).at[:D, :D].set(w1.T.astype(cdt))
    w2_t = jnp.zeros((D_pad, D_pad), cdt).at[:D, :D].set(w2.T.astype(cdt))
    b1_r = jnp.zeros((1, D_pad), jnp.float32).at[0, :D].set(
        jnp.asarray(b1).astype(jnp.float32))
    b2_r = jnp.zeros((1, D_pad), jnp.float32).at[0, :D].set(
        jnp.asarray(b2).astype(jnp.float32))
    return {"w1t": w1_t, "b1": b1_r, "w2t": w2_t, "b2": b2_r,
            "dim": D, "dim_pad": D_pad, "compute_dtype": cdt}


# ----------------------------------------------------------------------------
# Forward
# ----------------------------------------------------------------------------
def fcl_apply(x, params, *, tm=None, tn=None, out_dtype=None,
              force_col_tiling=False):
    """Apply the packed FCL to x of shape (M, D)."""
    M, D_in = x.shape
    D, D_pad, cdt = params["dim"], params["dim_pad"], params["compute_dtype"]
    assert D_in == D, f"x feature dim {D_in} != packed dim {D}"
    out_dtype = jnp.dtype(out_dtype) if out_dtype is not None else jnp.dtype(x.dtype)

    w1_t, b1_r, w2_t, b2_r = params["w1t"], params["b1"], params["w2t"], params["b2"]
    w_item = cdt.itemsize
    out_item = out_dtype.itemsize

    # ---- x staging ----------------------------------------------------------
    lane_aligned = (D % 128 == 0)
    if lane_aligned:
        # Fast path: no padded copy of x, no output slice; cast in-kernel.
        x_in = jnp.asarray(x)
        M_rows = M
    else:
        # Lane padding must be true zeros (zero weight rows x garbage could be
        # NaN), so materialize a padded copy, cast to the compute dtype.
        rm0 = max(_sublane(cdt), _sublane(out_dtype))
        M_rows = _round_up(M, rm0)
        x_in = jnp.zeros((M_rows, D_pad), cdt).at[:M, :D].set(
            jnp.asarray(x).astype(cdt))
    x_item = jnp.dtype(x_in.dtype).itemsize
    row_mult = max(_sublane(x_in.dtype), _sublane(out_dtype))

    # ---- row tile: ~512 KiB x tiles; >=2 grid steps when M allows (v7x 2 TCs)
    if tm is None:
        tm = (512 * 1024) // max(1, D_pad * x_item)
        tm = max(row_mult, min(2048, tm))
        if M_rows > row_mult:
            tm = min(tm, _round_up(pl.cdiv(M_rows, 2), row_mult))
    tm = min(_round_up(max(tm, row_mult), row_mult), _round_up(M_rows, row_mult))

    # ---- VMEM budgeting / path selection ------------------------------------
    capacity = _vmem_capacity_bytes()
    budget = int(0.7 * capacity)

    def resident_need(tm_):
        return (2 * tm_ * D_pad * x_item        # x tile, double buffered
                + 2 * tm_ * D_pad * out_item    # out tile, double buffered
                + 2 * D_pad * D_pad * w_item    # W1 + W2, single buffered
                + 4 * D_pad * 4                 # biases (f32)
                + 2 * tm_ * D_pad * 4)          # f32 intermediates

    use_col = force_col_tiling or resident_need(tm) > budget

    if use_col:
        if tn is None:
            tn = min(D_pad, 512)
        tn = min(_round_up(tn, 128), D_pad)

        def col_need(tm_):
            return (2 * tm_ * D_pad * x_item + 2 * tm_ * tn * out_item
                    + D_pad * D_pad * w_item        # W1 resident, single buffer
                    + 2 * D_pad * tn * w_item       # W2 slab, double buffered
                    + 2 * D_pad * 4 + 4 * tn * 4
                    + tm_ * D_pad * 4               # h scratch (f32)
                    + tm_ * tn * 4)                 # f32 y intermediate
        while tm > row_mult and col_need(tm) > budget:
            tm = _round_up(max(row_mult, tm // 2), row_mult)
        need = col_need(tm)
    else:
        need = resident_need(tm)

    vmem_limit = int(min(capacity - (8 << 20), max(32 << 20, need + (8 << 20))))

    cost = pl.CostEstimate(
        flops=int(4 * M_rows * D_pad * D_pad),
        transcendentals=0,
        bytes_accessed=int(M_rows * D_pad * (x_item + out_item)
                           + 2 * D_pad * D_pad * w_item + 4 * D_pad * 4))

    const = dict(pipeline_mode=pl.Buffered(1))   # constant blocks: 1 buffer

    if not use_col:
        grid = (pl.cdiv(M_rows, tm),)
        out = pl.pallas_call(
            _fcl_kernel_resident,
            out_shape=jax.ShapeDtypeStruct((M_rows, D_pad), out_dtype),
            grid_spec=pltpu.PrefetchScalarGridSpec(
                num_scalar_prefetch=0,
                grid=grid,
                in_specs=[
                    pl.BlockSpec((tm, D_pad), lambda i: (i, 0)),                  # x
                    pl.BlockSpec((D_pad, D_pad), lambda i: (0, 0), **const),      # W1^T
                    pl.BlockSpec((1, D_pad), lambda i: (0, 0), **const),          # b1
                    pl.BlockSpec((D_pad, D_pad), lambda i: (0, 0), **const),      # W2^T
                    pl.BlockSpec((1, D_pad), lambda i: (0, 0), **const),          # b2
                ],
                out_specs=pl.BlockSpec((tm, D_pad), lambda i: (i, 0)),
            ),
            compiler_params=pltpu.CompilerParams(
                dimension_semantics=("parallel",),
                vmem_limit_bytes=vmem_limit),
            cost_estimate=cost,
        )(x_in, w1_t, b1_r, w2_t, b2_r)
    else:
        grid = (pl.cdiv(M_rows, tm), pl.cdiv(D_pad, tn))
        out = pl.pallas_call(
            _fcl_kernel_coltiled,
            out_shape=jax.ShapeDtypeStruct((M_rows, D_pad), out_dtype),
            grid_spec=pltpu.PrefetchScalarGridSpec(
                num_scalar_prefetch=0,
                grid=grid,
                in_specs=[
                    pl.BlockSpec((tm, D_pad), lambda i, j: (i, 0)),               # x
                    pl.BlockSpec((D_pad, D_pad), lambda i, j: (0, 0), **const),   # W1^T
                    pl.BlockSpec((1, D_pad), lambda i, j: (0, 0), **const),       # b1
                    pl.BlockSpec((D_pad, tn), lambda i, j: (0, j)),               # W2^T slab
                    pl.BlockSpec((1, tn), lambda i, j: (0, j)),                   # b2 slab
                ],
                out_specs=pl.BlockSpec((tm, tn), lambda i, j: (i, j)),
                scratch_shapes=[pltpu.VMEM((tm, D_pad), jnp.float32)],            # h
            ),
            compiler_params=pltpu.CompilerParams(
                dimension_semantics=("parallel", "arbitrary"),
                vmem_limit_bytes=vmem_limit),
            cost_estimate=cost,
        )(x_in, w1_t, b1_r, w2_t, b2_r)

    if lane_aligned and M_rows == M:
        return out
    return out[:M, :D]


def fcl_forward(x, w1, b1, w2, b2, *, compute_dtype=jnp.bfloat16, **kwargs):
    """One-shot convenience wrapper (packs params per call). For inference
    loops, call pack_fcl_params once and reuse fcl_apply."""
    return fcl_apply(x, pack_fcl_params(w1, b1, w2, b2,
                                        compute_dtype=compute_dtype), **kwargs)


# ----------------------------------------------------------------------------
# Reference + test
# ----------------------------------------------------------------------------
def _reference(x, w1, b1, w2, b2):
    h = jnp.maximum(x @ w1.T + b1, 0.0)
    return jnp.maximum(h @ w2.T + b2, 0.0)


def _make_params(key, D):
    kw1, kb1, kw2, kb2 = jax.random.split(key, 4)
    bound = 1.0 / jnp.sqrt(jnp.float32(D))
    w1 = jax.random.uniform(kw1, (D, D), jnp.float32, -bound, bound)  # (out, in)
    b1 = jax.random.uniform(kb1, (D,), jnp.float32, -bound, bound)
    w2 = jax.random.uniform(kw2, (D, D), jnp.float32, -bound, bound)
    b2 = jax.random.uniform(kb2, (D,), jnp.float32, -bound, bound)
    return w1, b1, w2, b2


if __name__ == "__main__":
    key = jax.random.PRNGKey(0)
    k1, k2, k3, k4, k5, k6 = jax.random.split(key, 6)

    # --- Small shape consistent with the module (config['initial_dim']=32) ---
    batch, D = 8, 32
    x = jax.random.normal(k1, (batch, D), dtype=jnp.float32)
    w1, b1, w2, b2 = _make_params(k2, D)
    ref = _reference(x, w1, b1, w2, b2)

    packed_bf16 = pack_fcl_params(w1, b1, w2, b2)            # default bf16 MXU path
    out = jax.block_until_ready(fcl_apply(x, packed_bf16))
    assert out.shape == (batch, D) and out.dtype == x.dtype
    assert jnp.allclose(out, ref, atol=5e-2, rtol=5e-2), "bf16 mismatch vs reference"

    out_f32 = jax.block_until_ready(
        fcl_apply(x, pack_fcl_params(w1, b1, w2, b2, compute_dtype=jnp.float32)))
    assert jnp.allclose(out_f32, ref, atol=1e-5, rtol=1e-5), "f32 mismatch vs reference"

    # --- Lane-padded + multi-row-tile path (D not a multiple of 128) ---------
    M2, D2 = 512, 160
    x2 = jax.random.normal(k3, (M2, D2), dtype=jnp.float32)
    p2 = _make_params(k4, D2)
    ref2 = _reference(x2, *p2)
    out2 = jax.block_until_ready(fcl_forward(x2, *p2, compute_dtype=jnp.float32))
    assert out2.shape == (M2, D2)
    assert jnp.allclose(out2, ref2, atol=1e-4, rtol=1e-4), "tiled f32 mismatch"
    out2b = jax.block_until_ready(fcl_forward(x2, *p2))      # default bf16
    assert jnp.allclose(out2b, ref2, atol=6e-2, rtol=6e-2), "tiled bf16 mismatch"

    # --- Fast path (no x pad copy), ragged last row tile, bf16 output --------
    M3, D3 = 300, 256
    x3 = jax.random.normal(k5, (M3, D3), dtype=jnp.float32)
    p3 = _make_params(k6, D3)
    ref3 = _reference(x3, *p3)
    out3 = jax.block_until_ready(fcl_forward(x3, *p3, out_dtype=jnp.bfloat16))
    assert out3.shape == (M3, D3) and out3.dtype == jnp.bfloat16
    assert jnp.allclose(out3.astype(jnp.float32), ref3, atol=1e-1, rtol=1e-1), \
        "bf16-out mismatch"

    # --- Column-tiled W2 fallback (large-D / v7x path), exactness in f32 -----
    out3c = jax.block_until_ready(
        fcl_forward(x3, *p3, compute_dtype=jnp.float32,
                    force_col_tiling=True, tn=128))
    assert jnp.allclose(out3c, ref3, atol=1e-4, rtol=1e-4), "col-tiled mismatch"

    print("KERNEL_OK")
</pallas_src>

<mosaic_0001>
module attributes {stable_mosaic.version = 11 : i64} {
  func.func @_fcl_kernel_resident(%arg0: i32, %arg1: memref<16x128xbf16, #tpu.memory_space<vmem>>, %arg2: memref<128x128xbf16, #tpu.memory_space<vmem>>, %arg3: memref<1x128xf32, #tpu.memory_space<vmem>>, %arg4: memref<128x128xbf16, #tpu.memory_space<vmem>>, %arg5: memref<1x128xf32, #tpu.memory_space<vmem>>, %arg6: memref<16x128xf32, #tpu.memory_space<vmem>>) attributes {dimension_semantics = [#tpu.dimension_semantics<parallel>], iteration_bounds = array<i64: 1>, scalar_prefetch = 0 : i64, scratch_operands = 0 : i64, tpu.core_type = #tpu.core_type<tc>, window_params = [{transform_indices = @transform_0, window_bounds = array<i64: 16, 128>}, {pipeline_mode = #tpu.pipeline_mode<synchronous>, transform_indices = @transform_1, window_bounds = array<i64: 128, 128>}, {pipeline_mode = #tpu.pipeline_mode<synchronous>, transform_indices = @transform_2, window_bounds = array<i64: 1, 128>}, {pipeline_mode = #tpu.pipeline_mode<synchronous>, transform_indices = @transform_3, window_bounds = array<i64: 128, 128>}, {pipeline_mode = #tpu.pipeline_mode<synchronous>, transform_indices = @transform_4, window_bounds = array<i64: 1, 128>}, {transform_indices = @transform_5, window_bounds = array<i64: 16, 128>}]} {
    %c0 = arith.constant 0 : index
    %c0_0 = arith.constant 0 : index
    %0 = vector.load %arg1[%c0, %c0_0] : memref<16x128xbf16, #tpu.memory_space<vmem>>, vector<16x128xbf16>
    %c0_1 = arith.constant 0 : index
    %c0_2 = arith.constant 0 : index
    %1 = vector.load %arg2[%c0_1, %c0_2] : memref<128x128xbf16, #tpu.memory_space<vmem>>, vector<128x128xbf16>
    %cst = arith.constant dense<0.000000e+00> : vector<16x128xf32>
    %2 = tpu.matmul %0, %1, %cst {dimension_numbers = #tpu.dot_dimension_numbers<[1], [0], [0], [1], [0, 0, 1, 1], [], []>} : vector<16x128xbf16>, vector<128x128xbf16>, vector<16x128xf32> -> vector<16x128xf32>
    %c0_3 = arith.constant 0 : index
    %c0_4 = arith.constant 0 : index
    %3 = vector.load %arg3[%c0_3, %c0_4] : memref<1x128xf32, #tpu.memory_space<vmem>>, vector<1x128xf32>
    %4 = vector.broadcast %3 : vector<1x128xf32> to vector<16x128xf32>
    %5 = arith.addf %2, %4 : vector<16x128xf32>
    %cst_5 = arith.constant 0.000000e+00 : f32
    %6 = vector.broadcast %cst_5 : f32 to vector<16x128xf32>
    %7 = arith.maximumf %5, %6 : vector<16x128xf32>
    %8 = arith.truncf %7 : vector<16x128xf32> to vector<16x128xbf16>
    %c0_6 = arith.constant 0 : index
    %c0_7 = arith.constant 0 : index
    %9 = vector.load %arg4[%c0_6, %c0_7] : memref<128x128xbf16, #tpu.memory_space<vmem>>, vector<128x128xbf16>
    %cst_8 = arith.constant dense<0.000000e+00> : vector<16x128xf32>
    %10 = tpu.matmul %8, %9, %cst_8 {dimension_numbers = #tpu.dot_dimension_numbers<[1], [0], [0], [1], [0, 0, 1, 1], [], []>} : vector<16x128xbf16>, vector<128x128xbf16>, vector<16x128xf32> -> vector<16x128xf32>
    %c0_9 = arith.constant 0 : index
    %c0_10 = arith.constant 0 : index
    %11 = vector.load %arg5[%c0_9, %c0_10] : memref<1x128xf32, #tpu.memory_space<vmem>>, vector<1x128xf32>
    %12 = vector.broadcast %11 : vector<1x128xf32> to vector<16x128xf32>
    %13 = arith.addf %10, %12 : vector<16x128xf32>
    %cst_11 = arith.constant 0.000000e+00 : f32
    %14 = vector.broadcast %cst_11 : f32 to vector<16x128xf32>
    %15 = arith.maximumf %13, %14 : vector<16x128xf32>
    %c0_12 = arith.constant 0 : index
    %c0_13 = arith.constant 0 : index
    %16 = vector.load %arg6[%c0_12, %c0_13] : memref<16x128xf32, #tpu.memory_space<vmem>>, vector<16x128xf32>
    tpu.vector_store %arg6[%c0_12, %c0_13], %15 {strides = array<i32>} : memref<16x128xf32, #tpu.memory_space<vmem>>, vector<16x128xf32>,
    return
  }
  func.func @transform_0(%arg0: i32) -> (i32, i32) {
    %c0_i32 = arith.constant 0 : i32
    %c0_i32_0 = arith.constant 0 : i32
    return %arg0, %c0_i32 : i32, i32
  }
  func.func @transform_1(%arg0: i32) -> (i32, i32) {
    %c0_i32 = arith.constant 0 : i32
    %c0_i32_0 = arith.constant 0 : i32
    %c0_i32_1 = arith.constant 0 : i32
    return %c0_i32, %c0_i32_0 : i32, i32
  }
  func.func @transform_2(%arg0: i32) -> (i32, i32) {
    %c0_i32 = arith.constant 0 : i32
    %c0_i32_0 = arith.constant 0 : i32
    %c0_i32_1 = arith.constant 0 : i32
    return %c0_i32, %c0_i32_0 : i32, i32
  }
  func.func @transform_3(%arg0: i32) -> (i32, i32) {
    %c0_i32 = arith.constant 0 : i32
    %c0_i32_0 = arith.constant 0 : i32
    %c0_i32_1 = arith.constant 0 : i32
    return %c0_i32, %c0_i32_0 : i32, i32
  }
  func.func @transform_4(%arg0: i32) -> (i32, i32) {
    %c0_i32 = arith.constant 0 : i32
    %c0_i32_0 = arith.constant 0 : i32
    %c0_i32_1 = arith.constant 0 : i32
    return %c0_i32, %c0_i32_0 : i32, i32
  }
  func.func @transform_5(%arg0: i32) -> (i32, i32) {
    %c0_i32 = arith.constant 0 : i32
    %c0_i32_0 = arith.constant 0 : i32
    return %arg0, %c0_i32 : i32, i32
  }
}

</mosaic_0001>

<bundles_post_ra>
// kernel: tpu_custom_call.1
= control target key start
LH: loop header
LB: loop body
LE: loop exit
PB: predicated region body
PF: predicated region fallthrough
CT: control target
= control target key end

     0   :  { %10 = vsyncpa [#allocation3], 0  ;;  %s520_s0 = inlined_call_operand.hbm [shape: bf16[16,128], index: 0, kind: input, shape index: {}]   ;;  %s521_s1 = inlined_call_operand.hbm [shape: bf16[128,128], index: 1, kind: input, shape index: {}]   ;;  %s522_s2 = inlined_call_operand.vmem [shape: f32[1,128], index: 2, kind: input, shape index: {}]   ;;  %s523_s3 = inlined_call_operand.hbm [shape: bf16[128,128], index: 3, kind: input, shape index: {}]   ;;  %s524_s4 = inlined_call_operand.vmem [shape: f32[1,128], index: 4, kind: input, shape index: {}]   ;;  %s525_s5 = inlined_call_operand.hbm [shape: f32[16,128], index: 5, kind: output, shape index: {}]  }
   0x1   :  { %11 = vsyncpa [#allocation6], 0 }
   0x2   :  { %12 = vsyncpa [#allocation4], 0  ;;  %s30_s20 = sshll.u32 %s521_s1, 4  ;;  %s464_s21 = smov [#allocation5]   ;;  %s31_s20 = int_to_ptr.hbm [resolvable:$true] %s30_s20 }
   0x3   :  { %s32_s22 = sshll.u32 %s464_s21, 4  ;;  %s17_s25 = sshll.u32 %s520_s0, 4  ;;  %s33_s22 = int_to_ptr.vmem [resolvable:$true] %s32_s22  ;;  %s18_s25 = int_to_ptr.hbm [resolvable:$true] %s17_s25 }
   0x4   :  { %s465_s26 = smov 64   ;;  %s466_s27 = smov 4  }
   0x5   :  { %38 = dma.hbm_to_vmem [thread:$0]  %s31_s20, 1024, %s33_s22, [#allocation6], %s465_s26, %s465_s26, %s466_s27  }
   0x6   :  { %s467_s28 = smov [#allocation2]   ;;  %s45_s7 = sshll.u32 %s523_s3, 4  ;;  %s46_s7 = int_to_ptr.hbm [resolvable:$true] %s45_s7 }
   0x7   :  { %s19_s29 = sshll.u32 %s467_s28, 4  ;;  %s468_s1 = smov [#allocation7]   ;;  %s20_s29 = int_to_ptr.vmem [resolvable:$true] %s19_s29 }
   0x8   :  { %25 = dma.hbm_to_vmem [thread:$0]  %s18_s25, 128, %s20_s29, [#allocation3], %s465_s26, %s465_s26, %s466_s27  }
   0x9   :  { %s47_s8 = sshll.u32 %s468_s1, 4  ;;  %s48_s8 = int_to_ptr.vmem [resolvable:$true] %s47_s8 }
   0xa   :  { %53 = dma.hbm_to_vmem [thread:$0]  %s46_s7, 1024, %s48_s8, [#allocation6], %s465_s26, %s465_s26, %s466_s27  }
   0xb   :  { %458 = dma.done.wait [#allocation3], 128  }
   0xc   :  { %459 = vsyncadd [#allocation3], 4294967168 }
   0xd   :  { %460 = dma.done.wait [#allocation6], 2048  }
   0xe   :  { %461 = vsyncadd [#allocation6], 4294965248  ;;  %v343_v0 = vld [vmem:[#allocation5 + $0x38] sm:$0xff]  ;;  %v342_v1 = vld [vmem:[#allocation5 + $0x30] sm:$0xff]  ;;  %s469_s11 = smov [#allocation8]   ;;  %s470_s15 = smov 128  }
   0xf   :  { %144 = vmatpush.bf16.msra.mxu0 %v343_v0  ;;  %v351_v2 = vld [vmem:[#allocation7 + $0x38] sm:$0xff]  ;;  %v350_v3 = vld [vmem:[#allocation7 + $0x30] sm:$0xff]  ;;  %v341_v4 = vld [vmem:[#allocation5 + $0x28] sm:$0xff]  ;;  %s251_s12 = sshll.u32 %s469_s11, 4  ;;  %s471_s16 = smov 8   ;;  %s252_s12 = int_to_ptr.vmem [resolvable:$true] %s251_s12 }
  0x10   :  { %229 = vmatpush.bf16.msra.mxu1 %v351_v2  ;;  %v349_v5 = vld [vmem:[#allocation7 + $0x28] sm:$0xff]  ;;  %v340_v6 = vld [vmem:[#allocation5 + $0x20] sm:$0xff]  ;;  %v339_v8 = vld [vmem:[#allocation5 + $0x18] sm:$0xff] }
  0x11   :  { %v348_v7 = vld [vmem:[#allocation7 + $0x20] sm:$0xff]  ;;  %v338_v9 = vld [vmem:[#allocation5 + $0x10] sm:$0xff]  ;;  %v337_v10 = vld [vmem:[#allocation5 + $0x8] sm:$0xff] }
  0x12   :  { %v336_v11 = vld [vmem:[#allocation5] sm:$0xff]  ;;  %v335_v12 = vld [vmem:[#allocation2] sm:$0xff]  ;;  %v346_v14 = vld [vmem:[#allocation7 + $0x10] sm:$0xff] }
  0x13   :  { %145 = vmatpush.bf16.msra.mxu0 %v342_v1  ;;  %v347_v13 = vld [vmem:[#allocation7 + $0x18] sm:$0xff]  ;;  %v345_v15 = vld [vmem:[#allocation7 + $0x8] sm:$0xff]  ;;  %v344_v16 = vld [vmem:[#allocation7] sm:$0xff] }
  0x14   :  { %230 = vmatpush.bf16.msra.mxu1 %v350_v3  ;;  %v360_v18 = vld [vmem:[%s522_s2] ss:$0 sm:$0xff]  ;;  %s253_s2 = sshll.u32 %s525_s5, 4  ;;  %s254_s2 = int_to_ptr.hbm [resolvable:$true] %s253_s2 }
  0x15   :  { %v361_v25 = vld [vmem:[%s524_s4] ss:$0 sm:$0xff] }
  0x17   :  { %146 = vmatpush.bf16.msra.mxu0 %v341_v4 }
  0x18   :  { %231 = vmatpush.bf16.msra.mxu1 %v349_v5 }
  0x1b   :  { %147 = vmatpush.bf16.msra.mxu0 %v340_v6 }
  0x1c   :  { %232 = vmatpush.bf16.msra.mxu1 %v348_v7 }
  0x1f   :  { %148 = vmatpush.bf16.msra.mxu0 %v339_v8 }
  0x20   :  { %233 = vmatpush.bf16.msra.mxu1 %v347_v13 }
  0x23   :  { %149 = vmatpush.bf16.msra.mxu0 %v338_v9 }
  0x24   :  { %234 = vmatpush.bf16.msra.mxu1 %v346_v14 }
  0x27   :  { %150 = vmatpush.bf16.msra.mxu0 %v337_v10 }
  0x28   :  { %235 = vmatpush.bf16.msra.mxu1 %v345_v15 }
  0x2b   :  { %151 = vmatpush.bf16.msra.mxu0 %v336_v11 }
  0x2c   :  { %236 = vmatpush.bf16.msra.mxu1 %v344_v16 }
  0x2e   :  { %152 = vmatmul.bf16.vlgmr.msra.gmra.mxu0 %v335_v12 }
  0xab   :  { %v153_v17 = vpop.f32.mrf.mxu0 }
  0xac   :  { %v154_v19 = vadd.f32 %v360_v18, %v153_v17 }
  0xae   :  { %v158_v22 = vmax.f32 %v154_v19, 0.0 }
  0xb3   :  { %v155_v20 = vpop.f32.mrf.mxu0 }
  0xb4   :  { %v156_v21 = vadd.f32 %v360_v18, %v155_v20 }
  0xb6   :  { %v159_v23 = vmax.f32 %v156_v21, 0.0 }
  0xb8   :  { %v160_v24 = vpack.c.bf16 %v159_v23, %v158_v22 }
  0xba   :  { %237 = vmatmul.bf16.vlgmr.msra.gmra.mxu1 %v160_v24 }
 0x137   :  { %v238_v26 = vpop.f32.mrf.mxu1 }
 0x138   :  { %v239_v27 = vadd.f32 %v361_v25, %v238_v26 }
 0x13a   :  { %v243_v28 = vmax.f32 %v239_v27, 0.0 }
 0x13c   :  { %245 = vst [vmem:[#allocation8] sm:$0xff] %v243_v28 }
 0x13f   :  { %v240_v29 = vpop.f32.mrf.mxu1 }
 0x140   :  { %v241_v30 = vadd.f32 %v361_v25, %v240_v29 }
 0x142   :  { %v244_v31 = vmax.f32 %v241_v30, 0.0 }
 0x144   :  { %246 = vst [vmem:[#allocation8 + $0x8] sm:$0xff] %v244_v31 }
 0x145   :  { %259 = dma.vmem_to_hbm [thread:$0]  %s252_s12, 256, %s254_s2, [#allocation4], %s470_s15, %s470_s15, %s471_s16  }
 0x146   :  { %462 = dma.done.wait [#allocation4], 256  }
 0x147   :  { %463 = vsyncadd [#allocation4], 4294967040 }
 0x148   :  { %264 = vsyncpa [#allocation3], 1 }
 0x149   :  { %265 = vsyncpa [#allocation6], 1 }
 0x14a   :  { %266 = vsyncpa [#allocation4], 1 }

</bundles_post_ra>
